<compile_context>
chip_gen: v5e
topology: v5e:2x2
jax: 0.10.0
libtpu: 0.0.40
codegen_flags: <defaults>
</compile_context>

<pallas_src>
import functools

import jax
import jax.numpy as jnp
import numpy as np
from jax.experimental import pallas as pl
from jax.experimental.pallas import tpu as pltpu


def _round_up(x: int, m: int) -> int:
    return (x + m - 1) // m * m


def _pick_m_tile(hw: int, cap: int = 2048) -> int:
    """Pixels per grid step. Whole image if small; else the largest divisor of
    hw that is a multiple of 256 (full MXU M on v6e/v7x), else a multiple of 8,
    else the whole image (full-dim blocks are always legal)."""
    if hw <= cap:
        return hw
    best8 = best256 = None
    for d in range(8, cap + 1, 8):
        if hw % d == 0:
            best8 = d
            if d % 256 == 0:
                best256 = d
    return best256 or best8 or hw


# ----------------------------------------------------------------------------
# Fused kernel: K-packed conv matmul (+bias, ReLU) -> pooled-sum -> fc on last
# ----------------------------------------------------------------------------
def _fused_conv_pool_fc_kernel(p_ref, wc_ref, bc_ref, wf_ref, bf_ref,
                               o_ref, acc_ref, *, inv_hw):
    """
    p_ref  : [m_tile, K_pad]     bf16  im2col patches for this row-tile
    wc_ref : [K_pad, Cout_pad]   bf16  conv weights, tap-major K-packed
    bc_ref : [1, Cout_pad]       f32   conv bias
    wf_ref : [Cout_pad, NC_pad]  bf16  fc weights
    bf_ref : [1, NC_pad]         f32   fc bias
    o_ref  : [1, NC_pad]         f32   logits for this batch element
    acc_ref: [1, Cout_pad]       f32   running pooled sum (VMEM scratch)
    """
    t = pl.program_id(1)

    @pl.when(t == 0)
    def _init():
        acc_ref[...] = jnp.zeros_like(acc_ref)

    # 3x3 conv over this row-tile as a single K-packed MXU matmul.
    conv = jnp.dot(p_ref[...], wc_ref[...],
                   preferred_element_type=jnp.float32)   # [m_tile, Cout_pad]

    # bias + ReLU in f32, then accumulate the global-average-pool numerator.
    feat = jnp.maximum(conv + bc_ref[...], 0.0)
    acc_ref[...] += jnp.sum(feat, axis=0, keepdims=True)  # [1, Cout_pad]

    @pl.when(t == pl.num_programs(1) - 1)
    def _finalize():
        pooled = acc_ref[...] * inv_hw                     # mean, f32
        logits = jnp.dot(pooled.astype(jnp.bfloat16), wf_ref[...],
                         preferred_element_type=jnp.float32) + bf_ref[...]
        o_ref[...] = logits.astype(o_ref.dtype)


# ----------------------------------------------------------------------------
# Forward wrapper: layout/padding/im2col glue + single fused pallas_call
# ----------------------------------------------------------------------------
def torchvision_model_forward(x_nchw, conv_w, conv_b, fc_w, fc_b, *,
                              m_tile_cap=2048):
    """Equivalent of TorchvisionModel.forward(x) for the synthetic backbone.

    x_nchw : [N, Cin, H, W]       (PyTorch layout)
    conv_w : [Cout, Cin, 3, 3]    conv_b : [Cout]
    fc_w   : [num_classes, Cout]  (PyTorch nn.Linear layout)  fc_b : [num_classes]
    returns logits [N, num_classes]
    """
    N, Cin, H, W = x_nchw.shape
    Cout = conv_w.shape[0]
    num_classes = fc_w.shape[0]

    HW = H * W
    K = 9 * Cin
    K_p = _round_up(K, 8)                  # tidy sublane packing for the RHS
    cout_p = _round_up(Cout, 128)          # lane-dense channel dim
    nc_p = _round_up(num_classes, 128)     # lane-dense logits dim

    m_tile = _pick_m_tile(HW, m_tile_cap)
    T = HW // m_tile

    # --- im2col on the wrapper side (bf16, one fused XLA pass) --------------
    # Non-overlapping row tiles of K-packed patches: no halo duplication, no
    # per-tap relayout inside the kernel.
    x_nhwc = jnp.transpose(x_nchw, (0, 2, 3, 1)).astype(jnp.bfloat16)
    x_pad = jnp.pad(x_nhwc, ((0, 0), (1, 1), (1, 1), (0, 0)))
    patches = jnp.concatenate(
        [x_pad[:, dh:dh + H, dw:dw + W, :] for dh in range(3) for dw in range(3)],
        axis=-1)                                          # [N, H, W, 9*Cin]
    patches = jnp.pad(patches, ((0, 0), (0, 0), (0, 0), (0, K_p - K)))
    patches = patches.reshape(N, HW, K_p)                 # [N, HW, K_p] bf16

    # Conv weights: [Cout,Cin,3,3] -> [kh,kw,Cin,Cout] -> K-packed [K_p,Cout_p]
    wc = jnp.transpose(conv_w, (2, 3, 1, 0))
    wc = jnp.pad(wc, ((0, 0), (0, 0), (0, 0), (0, cout_p - Cout)))
    wc = wc.reshape(K, cout_p)
    wc = jnp.pad(wc, ((0, K_p - K), (0, 0))).astype(jnp.bfloat16)
    bc = jnp.pad(conv_b, (0, cout_p - Cout)).reshape(1, cout_p).astype(jnp.float32)

    # fc: [num_classes, Cout] -> [Cout_pad, NC_pad] (zero padding is exact).
    wf = jnp.pad(fc_w.T, ((0, cout_p - Cout), (0, nc_p - num_classes)))
    wf = wf.astype(jnp.bfloat16)
    bf = jnp.pad(fc_b, (0, nc_p - num_classes)).reshape(1, nc_p).astype(jnp.float32)

    kernel = functools.partial(_fused_conv_pool_fc_kernel, inv_hw=1.0 / HW)

    flops = 2 * N * HW * K_p * cout_p + 2 * N * cout_p * nc_p
    bytes_accessed = (patches.size * 2 + wc.size * 2 + wf.size * 2
                      + bc.size * 4 + bf.size * 4 + N * nc_p * 4)

    out = pl.pallas_call(
        kernel,
        out_shape=jax.ShapeDtypeStruct((N, 1, nc_p), jnp.float32),
        grid_spec=pltpu.PrefetchScalarGridSpec(
            num_scalar_prefetch=0,
            grid=(N, T),
            in_specs=[
                pl.BlockSpec((None, m_tile, K_p), lambda b, t: (b, t, 0)),
                pl.BlockSpec((K_p, cout_p), lambda b, t: (0, 0)),
                pl.BlockSpec((1, cout_p), lambda b, t: (0, 0)),
                pl.BlockSpec((cout_p, nc_p), lambda b, t: (0, 0)),
                pl.BlockSpec((1, nc_p), lambda b, t: (0, 0)),
            ],
            out_specs=pl.BlockSpec((None, 1, nc_p), lambda b, t: (b, 0, 0)),
            scratch_shapes=[pltpu.VMEM((1, cout_p), jnp.float32)],
        ),
        compiler_params=pltpu.CompilerParams(
            dimension_semantics=("parallel", "arbitrary"),
            vmem_limit_bytes=32 * 1024 * 1024,
        ),
        cost_estimate=pl.CostEstimate(
            flops=flops, transcendentals=0, bytes_accessed=bytes_accessed),
    )(patches, wc, bc, wf, bf)

    return out[:, 0, :num_classes]


# ----------------------------------------------------------------------------
# Pure-JAX reference (for correctness check only)
# ----------------------------------------------------------------------------
def _reference_forward(x_nchw, conv_w, conv_b, fc_w, fc_b):
    x = jnp.transpose(x_nchw, (0, 2, 3, 1))
    k = jnp.transpose(conv_w, (2, 3, 1, 0))
    y = jax.lax.conv_general_dilated(
        x, k, window_strides=(1, 1), padding="SAME",
        dimension_numbers=("NHWC", "HWIO", "NHWC"))
    y = jnp.maximum(y + conv_b, 0.0)
    pooled = jnp.mean(y, axis=(1, 2))
    return pooled @ fc_w.T + fc_b


# ----------------------------------------------------------------------------
# Main
# ----------------------------------------------------------------------------
if __name__ == "__main__":
    key = jax.random.PRNGKey(0)
    k_x, k_cw, k_cb, k_fw, k_fb = jax.random.split(key, 5)

    N, Cin, H, W = 2, 3, 16, 16       # torchvision models take 3-channel images
    Cout, num_classes = 32, 10        # num_ftrs = Cout (synthetic), fc replaced

    x = jax.random.normal(k_x, (N, Cin, H, W), jnp.float32)
    conv_w = 0.1 * jax.random.normal(k_cw, (Cout, Cin, 3, 3), jnp.float32)
    conv_b = 0.1 * jax.random.normal(k_cb, (Cout,), jnp.float32)
    fc_w = 0.1 * jax.random.normal(k_fw, (num_classes, Cout), jnp.float32)
    fc_b = 0.1 * jax.random.normal(k_fb, (num_classes,), jnp.float32)

    fwd = jax.jit(torchvision_model_forward)
    logits = fwd(x, conv_w, conv_b, fc_w, fc_b)
    jax.block_until_ready(logits)

    assert logits.shape == (N, num_classes), logits.shape
    assert logits.dtype == jnp.float32

    # bf16 MXU inputs vs. f32 reference -> tolerance accounts for ~1e-2 drift
    # (PyTorch runs this stem in f32; bf16 is intentional for MXU throughput).
    ref = _reference_forward(x, conv_w, conv_b, fc_w, fc_b)
    np.testing.assert_allclose(np.asarray(logits), np.asarray(ref),
                               atol=5e-2, rtol=5e-2)
    print("KERNEL_OK")
</pallas_src>

<mosaic_0001>
module attributes {stable_mosaic.version = 11 : i64} {
  func.func @_fused_conv_pool_fc_kernel(%arg0: i32, %arg1: i32, %arg2: memref<1x256x32xbf16, #tpu.memory_space<vmem>>, %arg3: memref<32x128xbf16, #tpu.memory_space<vmem>>, %arg4: memref<1x128xf32, #tpu.memory_space<vmem>>, %arg5: memref<128x128xbf16, #tpu.memory_space<vmem>>, %arg6: memref<1x128xf32, #tpu.memory_space<vmem>>, %arg7: memref<1x1x128xf32, #tpu.memory_space<vmem>>, %arg8: memref<1x128xf32, #tpu.memory_space<vmem>>) attributes {dimension_semantics = [#tpu.dimension_semantics<parallel>, #tpu.dimension_semantics<arbitrary>], iteration_bounds = array<i64: 2, 1>, scalar_prefetch = 0 : i64, scratch_operands = 1 : i64, tpu.core_type = #tpu.core_type<tc>, window_params = [{transform_indices = @transform_0, window_bounds = array<i64: 1, 256, 32>}, {pipeline_mode = #tpu.pipeline_mode<synchronous>, transform_indices = @transform_1, window_bounds = array<i64: 32, 128>}, {pipeline_mode = #tpu.pipeline_mode<synchronous>, transform_indices = @transform_2, window_bounds = array<i64: 1, 128>}, {pipeline_mode = #tpu.pipeline_mode<synchronous>, transform_indices = @transform_3, window_bounds = array<i64: 128, 128>}, {pipeline_mode = #tpu.pipeline_mode<synchronous>, transform_indices = @transform_4, window_bounds = array<i64: 1, 128>}, {transform_indices = @transform_5, window_bounds = array<i64: 1, 1, 128>}]} {
    %c0_i32 = arith.constant 0 : i32
    %0 = arith.cmpi eq, %arg1, %c0_i32 : i32
    %1 = arith.extui %0 : i1 to i32
    %c0_i32_0 = arith.constant 0 : i32
    %2 = arith.cmpi ne, %1, %c0_i32_0 : i32
    scf.if %2 {
      %cst_15 = arith.constant 0.000000e+00 : f32
      %20 = vector.broadcast %cst_15 : f32 to vector<1x128xf32>
      %c0_16 = arith.constant 0 : index
      %c0_17 = arith.constant 0 : index
      %21 = vector.load %arg8[%c0_16, %c0_17] : memref<1x128xf32, #tpu.memory_space<vmem>>, vector<1x128xf32>
      tpu.vector_store %arg8[%c0_16, %c0_17], %20 {strides = array<i32>} : memref<1x128xf32, #tpu.memory_space<vmem>>, vector<1x128xf32>,
    } else {
    }
    %c0 = arith.constant 0 : index
    %c0_1 = arith.constant 0 : index
    %c0_2 = arith.constant 0 : index
    %3 = vector.load %arg2[%c0, %c0_1, %c0_2] : memref<1x256x32xbf16, #tpu.memory_space<vmem>>, vector<1x256x32xbf16>
    %4 = vector.shape_cast %3 : vector<1x256x32xbf16> to vector<256x32xbf16>
    %c0_3 = arith.constant 0 : index
    %c0_4 = arith.constant 0 : index
    %5 = vector.load %arg3[%c0_3, %c0_4] : memref<32x128xbf16, #tpu.memory_space<vmem>>, vector<32x128xbf16>
    %cst = arith.constant dense<0.000000e+00> : vector<256x128xf32>
    %6 = tpu.matmul %4, %5, %cst {dimension_numbers = #tpu.dot_dimension_numbers<[1], [0], [0], [1], [0, 0, 1, 1], [], []>} : vector<256x32xbf16>, vector<32x128xbf16>, vector<256x128xf32> -> vector<256x128xf32>
    %c0_5 = arith.constant 0 : index
    %c0_6 = arith.constant 0 : index
    %7 = vector.load %arg4[%c0_5, %c0_6] : memref<1x128xf32, #tpu.memory_space<vmem>>, vector<1x128xf32>
    %8 = vector.broadcast %7 : vector<1x128xf32> to vector<256x128xf32>
    %9 = arith.addf %6, %8 : vector<256x128xf32>
    %cst_7 = arith.constant 0.000000e+00 : f32
    %10 = vector.broadcast %cst_7 : f32 to vector<256x128xf32>
    %11 = arith.maximumf %9, %10 : vector<256x128xf32>
    %c0_8 = arith.constant 0 : index
    %c0_9 = arith.constant 0 : index
    %12 = vector.load %arg8[%c0_8, %c0_9] : memref<1x128xf32, #tpu.memory_space<vmem>>, vector<1x128xf32>
    %cst_10 = arith.constant dense<0.000000e+00> : vector<128xf32>
    %13 = vector.multi_reduction <add>, %11, %cst_10 [0] : vector<256x128xf32> to vector<128xf32>
    %14 = vector.shape_cast %13 : vector<128xf32> to vector<1x128xf32>
    %15 = arith.addf %12, %14 : vector<1x128xf32>
    %c0_11 = arith.constant 0 : index
    %c0_12 = arith.constant 0 : index
    %16 = vector.load %arg8[%c0_11, %c0_12] : memref<1x128xf32, #tpu.memory_space<vmem>>, vector<1x128xf32>
    tpu.vector_store %arg8[%c0_11, %c0_12], %15 {strides = array<i32>} : memref<1x128xf32, #tpu.memory_space<vmem>>, vector<1x128xf32>,
    %c0_i32_13 = arith.constant 0 : i32
    %17 = arith.cmpi eq, %arg1, %c0_i32_13 : i32
    %18 = arith.extui %17 : i1 to i32
    %c0_i32_14 = arith.constant 0 : i32
    %19 = arith.cmpi ne, %18, %c0_i32_14 : i32
    scf.if %19 {
      %c0_15 = arith.constant 0 : index
      %c0_16 = arith.constant 0 : index
      %20 = vector.load %arg8[%c0_15, %c0_16] : memref<1x128xf32, #tpu.memory_space<vmem>>, vector<1x128xf32>
      %cst_17 = arith.constant 3.906250e-03 : f32
      %21 = vector.broadcast %cst_17 : f32 to vector<1x128xf32>
      %22 = arith.mulf %20, %21 : vector<1x128xf32>
      %23 = arith.truncf %22 : vector<1x128xf32> to vector<1x128xbf16>
      %c0_18 = arith.constant 0 : index
      %c0_19 = arith.constant 0 : index
      %24 = vector.load %arg5[%c0_18, %c0_19] : memref<128x128xbf16, #tpu.memory_space<vmem>>, vector<128x128xbf16>
      %cst_20 = arith.constant dense<0.000000e+00> : vector<1x128xf32>
      %25 = tpu.matmul %23, %24, %cst_20 {dimension_numbers = #tpu.dot_dimension_numbers<[1], [0], [0], [1], [0, 0, 1, 1], [], []>} : vector<1x128xbf16>, vector<128x128xbf16>, vector<1x128xf32> -> vector<1x128xf32>
      %c0_21 = arith.constant 0 : index
      %c0_22 = arith.constant 0 : index
      %26 = vector.load %arg6[%c0_21, %c0_22] : memref<1x128xf32, #tpu.memory_space<vmem>>, vector<1x128xf32>
      %27 = arith.addf %25, %26 : vector<1x128xf32>
      %c0_23 = arith.constant 0 : index
      %c0_24 = arith.constant 0 : index
      %c0_25 = arith.constant 0 : index
      %28 = vector.load %arg7[%c0_23, %c0_24, %c0_25] : memref<1x1x128xf32, #tpu.memory_space<vmem>>, vector<1x1x128xf32>
      %29 = vector.shape_cast %28 : vector<1x1x128xf32> to vector<1x128xf32>
      %30 = vector.shape_cast %27 : vector<1x128xf32> to vector<1x1x128xf32>
      tpu.vector_store %arg7[%c0_23, %c0_24, %c0_25], %30 {strides = array<i32>} : memref<1x1x128xf32, #tpu.memory_space<vmem>>, vector<1x1x128xf32>,
    } else {
    }
    return
  }
  func.func @transform_0(%arg0: i32, %arg1: i32) -> (i32, i32, i32) {
    %c0_i32 = arith.constant 0 : i32
    %c0_i32_0 = arith.constant 0 : i32
    return %arg0, %arg1, %c0_i32 : i32, i32, i32
  }
  func.func @transform_1(%arg0: i32, %arg1: i32) -> (i32, i32) {
    %c0_i32 = arith.constant 0 : i32
    %c0_i32_0 = arith.constant 0 : i32
    %c0_i32_1 = arith.constant 0 : i32
    return %c0_i32, %c0_i32_0 : i32, i32
  }
  func.func @transform_2(%arg0: i32, %arg1: i32) -> (i32, i32) {
    %c0_i32 = arith.constant 0 : i32
    %c0_i32_0 = arith.constant 0 : i32
    %c0_i32_1 = arith.constant 0 : i32
    return %c0_i32, %c0_i32_0 : i32, i32
  }
  func.func @transform_3(%arg0: i32, %arg1: i32) -> (i32, i32) {
    %c0_i32 = arith.constant 0 : i32
    %c0_i32_0 = arith.constant 0 : i32
    %c0_i32_1 = arith.constant 0 : i32
    return %c0_i32, %c0_i32_0 : i32, i32
  }
  func.func @transform_4(%arg0: i32, %arg1: i32) -> (i32, i32) {
    %c0_i32 = arith.constant 0 : i32
    %c0_i32_0 = arith.constant 0 : i32
    %c0_i32_1 = arith.constant 0 : i32
    return %c0_i32, %c0_i32_0 : i32, i32
  }
  func.func @transform_5(%arg0: i32, %arg1: i32) -> (i32, i32, i32) {
    %c0_i32 = arith.constant 0 : i32
    %c0_i32_0 = arith.constant 0 : i32
    %c0_i32_1 = arith.constant 0 : i32
    return %arg0, %c0_i32, %c0_i32_0 : i32, i32, i32
  }
}

</mosaic_0001>

<bundles_post_ra>
// kernel: torchvision_model_forward.1
= control target key start
LH: loop header
LB: loop body
LE: loop exit
PB: predicated region body
PF: predicated region fallthrough
CT: control target
= control target key end

     0   :  { %10 = vsyncpa [#allocation4], 0  ;;  %s1318_s0 = inlined_call_operand.vmem [shape: bf16[2,256,32], index: 0, kind: input, shape index: {}]   ;;  %s1319_s1 = inlined_call_operand.vmem [shape: bf16[32,128], index: 1, kind: input, shape index: {}]   ;;  %s1320_s2 = inlined_call_operand.vmem [shape: f32[1,128], index: 2, kind: input, shape index: {}]   ;;  %s1321_s3 = inlined_call_operand.vmem [shape: bf16[128,128], index: 3, kind: input, shape index: {}]   ;;  %s1322_s4 = inlined_call_operand.vmem [shape: f32[1,128], index: 4, kind: input, shape index: {}]   ;;  %s1323_s5 = inlined_call_operand.hbm [shape: f32[2,1,128], index: 5, kind: output, shape index: {}]  }
   0x1   :  { %12 = vsyncpa [#allocation4 + $0x1], 0  ;;  %s1093_s18 = smov 0   ;;  %s1095_s19 = smov 0  }
   0x2   :  { %s1097_s20 = smov 0   ;;  %s1099_s21 = smov 0  }
   0x3   :  { %s1101_s22 = smov 0   ;;  %s1103_s23 = smov 0  }
   0x4 LB: > { %s765_s24 = sadd.s32 4294967295, %s1060_s23   ;;  %s766_s25 = sadd.s32 4294967294, %s1060_s23   ;;  %s1060_s23 = sphi %s1103_s23, %s18_s23   ;;  %s1056_s22 = sphi %s1101_s22, %s1330_s22   ;;  %s1052_s21 = sphi %s1099_s21, %s1329_s21   ;;  %s1048_s20 = sphi %s1097_s20, %s1328_s20   ;;  %s1044_s19 = sphi %s1095_s19, %s1327_s19   ;;  %s1040_s18 = sphi %s1093_s18, %s1326_s18  }
   0x5   : > { %s30_s26 = sadd.s32 1, %s1056_s22  ;;  %s149_s27 = sadd.s32 1, %s1048_s20 }
   0x6   : > { %p32_p0 = scmp.ge.s32.totalorder %s30_s26, 2  ;;  %p159_p1 = scmp.ne.s32.totalorder %s1048_s20, %s1044_s19 }
   0x7   : > { %p160_p2 = scmp.eq.s32.totalorder %s765_s24, 1  ;;  %p165_p3 = scmp.ne.s32.totalorder %s1044_s19, %s1040_s18 }
   0x8   : > { %s1332_s26 = smov (%p32_p0, %s30_s26), 0  ;;  %p166_p5 = scmp.eq.s32.totalorder %s766_s25, 1 }
   0x9   : > { %p1133_p4 = por %p160_p2, %p159_p1  ;;  %s146_s29 = ssub.s32 %s1056_s22, %s1332_s26 }
   0xa   : > { %p769_p6 = scmp.ge.s32.totalorder %s1060_s23, 1  ;;  %p147_p7 = scmp.eq.s32.totalorder %s146_s29, 0 }
   0xb   : > { %p1140_p8 = por %p166_p5, %p165_p3  ;;  %p209_p9 = scmp.lt.s32.totalorder %s1060_s23, 3 }
   0xc   : > { %s1146_s6 = scalar_select %p147_p7, %s1048_s20, %s149_s27  }
   0xd   : > { %p210_p10 = pnand %p769_p6, %p209_p9 }
   0xe   : > { %p241_p11 = scmp.lt.s32.totalorder (!%p210_p10), %s1052_s21, 1  ;;  %s238_s25 = sand.u32 (!%p210_p10), 1, %s1044_s19  }
   0xf   : > { %213 = sbr.rel (%p210_p10) target bundleno = 436 (0x1b4), region = 40  ;;  %s692_s7 = scalar_lea.hbm (!%p210_p10), %s1323_s5, %s1052_s21 }
  0x10   : > { %s239_s10 = scalar_lea.vmem (!%p210_p10), [#allocation3], %s238_s25  ;;  %s684_s13 = scalar_lea.sflag (!%p210_p10), [#allocation4], %s238_s25 }
  0x11   : > { %s1002_s17 = scalar_lea.hbm (!%p210_p10), %s1323_s5, 2 }
  0x14   : > { %v912_v0 = vld [vmem:[%s1319_s1 + $0x8] sm:$0xff]  ;;  %v911_v1 = vld [vmem:[%s1319_s1] sm:$0xff]  ;;  %s242_s11 = scalar_select %p241_p11, %s1052_s21, 1  ;;  %vm388_vm0 = vcmask 261120  }
  0x15   : > { %443 = vmatpush.bf16.msra.mxu0 %v912_v0  ;;  %921 = vmatpush.bf16.msra.mxu2 %v912_v0  ;;  %v1206_v36 = vld [vmem:[%s1320_s2] ss:$0 sm:$0xff] }
  0x16   : > { %922 = vmatpush.bf16.msra.mxu3 %v912_v0  ;;  %s894_s12 = sshll.u32 %s242_s11, 7  ;;  %s694_s11 = sshll.u32 %s239_s10, 4  ;;  %s695_s11 = int_to_ptr.vmem [resolvable:$true] %s694_s11 }
  0x17   : > { %s1159_s15 = scalar_lea.vmem %s1318_s0, %s894_s12  ;;  %s696_s12 = sshll.u32 %s692_s7, 4  ;;  %s697_s12 = int_to_ptr.hbm [resolvable:$true] %s696_s12 }
  0x18   : > { %v895_v2 = vld [vmem:[%s1159_s15] sm:$0xff]  ;;  %v900_v3 = vld [vmem:[%s1159_s15 + $0x28] sm:$0xff]  ;;  %v905_v4 = vld [vmem:[%s1159_s15 + $0x50] sm:$0xff]  ;;  %s996_s14 = sshra.s32 %s697_s12, 4  ;;  %s997_s14 = int_to_ptr.hbm [resolvable:$true] %s996_s14 }
  0x19   : > { %444 = vmatpush.bf16.msra.mxu0 %v911_v1  ;;  %923 = vmatpush.bf16.msra.mxu2 %v911_v1  ;;  %v896_v5 = vld [vmem:[%s1159_s15 + $0x8] sm:$0xff]  ;;  %v901_v6 = vld [vmem:[%s1159_s15 + $0x30] sm:$0xff]  ;;  %v906_v7 = vld [vmem:[%s1159_s15 + $0x58] sm:$0xff]  ;;  %p1003_p1 = scmp.lt.s32.totalorder %s997_s14, %s1323_s5 }
  0x1a   : > { %924 = vmatpush.bf16.msra.mxu3 %v911_v1  ;;  %v897_v8 = vld [vmem:[%s1159_s15 + $0x10] sm:$0xff]  ;;  %v902_v9 = vld [vmem:[%s1159_s15 + $0x38] sm:$0xff]  ;;  %v907_v10 = vld [vmem:[%s1159_s15 + $0x60] sm:$0xff] }
  0x1b   : > { %v898_v11 = vld [vmem:[%s1159_s15 + $0x18] sm:$0xff]  ;;  %v903_v12 = vld [vmem:[%s1159_s15 + $0x40] sm:$0xff]  ;;  %v908_v13 = vld [vmem:[%s1159_s15 + $0x68] sm:$0xff] }
  0x1c   : > { %844 = vmatmul.msk.bf16.vlgmr.msra.gmra.mxu0 %vm388_vm0, %v895_v2  ;;  %849 = vmatmul.msk.bf16.vlgmr.msra.gmra.mxu2 %vm388_vm0, %v900_v3  ;;  %v899_v14 = vld [vmem:[%s1159_s15 + $0x20] sm:$0xff]  ;;  %v904_v15 = vld [vmem:[%s1159_s15 + $0x48] sm:$0xff]  ;;  %v909_v16 = vld [vmem:[%s1159_s15 + $0x70] sm:$0xff] }
  0x1d   : > { %854 = vmatmul.msk.bf16.vlgmr.msra.gmra.mxu3 %vm388_vm0, %v905_v4  ;;  %v910_v17 = vld [vmem:[%s1159_s15 + $0x78] sm:$0xff]  ;;  %s998_s15 = scalar_lea.hbm %s997_s14, 1 }
  0x1e   : > { %p999_p12 = scmp.ne.s32.totalorder %s997_s14, %s998_s15  ;;  %p1004_p2 = scmp.lt.s32.totalorder %s1002_s17, %s998_s15 }
  0x20   : > { %p1000_p13 = pnand %p999_p12, %p1133_p4  ;;  %p1005_p3 = por %p1004_p2, %p1003_p1 }
  0x22   : > { %p1001_p0 = pneg %p1000_p13 }
  0x24   : > { %p1006_p5 = pnand %p1005_p3, %p1001_p0 }
  0x2c   : > { %845 = vmatmul.msk.bf16.gmra.mxu0 %vm388_vm0, %v896_v5  ;;  %850 = vmatmul.msk.bf16.gmra.mxu2 %vm388_vm0, %v901_v6 }
  0x2d   : > { %855 = vmatmul.msk.bf16.gmra.mxu3 %vm388_vm0, %v906_v7 }
  0x3c   : > { %846 = vmatmul.msk.bf16.gmra.mxu0 %vm388_vm0, %v897_v8  ;;  %851 = vmatmul.msk.bf16.gmra.mxu2 %vm388_vm0, %v902_v9 }
  0x3d   : > { %856 = vmatmul.msk.bf16.gmra.mxu3 %vm388_vm0, %v907_v10 }
  0x4c   : > { %847 = vmatmul.msk.bf16.gmra.mxu0 %vm388_vm0, %v898_v11  ;;  %852 = vmatmul.msk.bf16.gmra.mxu2 %vm388_vm0, %v903_v12 }
  0x4d   : > { %857 = vmatmul.msk.bf16.gmra.mxu3 %vm388_vm0, %v908_v13 }
  0x5c   : > { %848 = vmatmul.msk.bf16.gmra.mxu0 %vm388_vm0, %v899_v14  ;;  %853 = vmatmul.msk.bf16.gmra.mxu2 %vm388_vm0, %v904_v15 }
  0x5d   : > { %858 = vmatmul.msk.bf16.gmra.mxu3 %vm388_vm0, %v909_v16 }
  0x6d   : > { %859 = vmatmul.msk.bf16.gmra.mxu3 %vm388_vm0, %v910_v17 }
  0x99   : > { %v446_v18 = vpop.f32.mrf.mxu0 }
  0x9a   : > { %v447_v39 = vadd.f32 %v1206_v36, %v446_v18 }
  0x9c   : > { %v526_v45 = vmax.f32 %v447_v39, 0.0 }
  0x9f   : > { %v471_v19 = vpop.f32.mrf.mxu2 }
  0xa0   : > { %v1193_v20 = vpop.f32.mrf.mxu3  ;;  %v472_v5 = vadd.f32 %v1206_v36, %v471_v19 }
  0xa1   : > { %v448_v21 = vpop.f32.mrf.mxu0 }
  0xa2   : > { %v449_v38 = vadd.f32 %v1206_v36, %v448_v21  ;;  %v536_v11 = vmax.f32 %v472_v5, 0.0 }
  0xa4   : > { %v527_v42 = vmax.f32 %v449_v38, 0.0 }
  0xa6   : > { %v559_v48 = vadd.f32 %v527_v42, %v526_v45 }
  0xa7   : > { %v473_v22 = vpop.f32.mrf.mxu2 }
  0xa8   : > { %v1195_v23 = vpop.f32.mrf.mxu3  ;;  %v474_v8 = vadd.f32 %v1206_v36, %v473_v22 }
  0xa9   : > { %v451_v24 = vpop.f32.mrf.mxu0 }
  0xaa   : > { %v452_v40 = vadd.f32 %v1206_v36, %v451_v24  ;;  %v537_v15 = vmax.f32 %v474_v8, 0.0 }
  0xac   : > { %v528_v46 = vmax.f32 %v452_v40, 0.0 }
  0xae   : > { %v560_v52 = vadd.f32 %v559_v48, %v528_v46 }
  0xaf   : > { %v476_v25 = vpop.f32.mrf.mxu2 }
  0xb0   : > { %v1197_v26 = vpop.f32.mrf.mxu3  ;;  %v477_v12 = vadd.f32 %v1206_v36, %v476_v25 }
  0xb1   : > { %v453_v27 = vpop.f32.mrf.mxu0 }
  0xb2   : > { %v454_v43 = vadd.f32 %v1206_v36, %v453_v27  ;;  %v538_v18 = vmax.f32 %v477_v12, 0.0 }
  0xb4   : > { %v529_v49 = vmax.f32 %v454_v43, 0.0 }
  0xb6   : > { %v561_v56 = vadd.f32 %v560_v52, %v529_v49  ;;  %v918_v49 = vld [vmem:[%s1321_s3 + $0x28] sm:$0xff] }
  0xb7   : > { %v478_v28 = vpop.f32.mrf.mxu2 }
  0xb8   : > { %v1199_v30 = vpop.f32.mrf.mxu3  ;;  %v479_v16 = vadd.f32 %v1206_v36, %v478_v28 }
  0xb9   : > { %v456_v29 = vpop.f32.mrf.mxu0 }
  0xba   : > { %v457_v47 = vadd.f32 %v1206_v36, %v456_v29  ;;  %v539_v27 = vmax.f32 %v479_v16, 0.0 }
  0xbc   : > { %v530_v53 = vmax.f32 %v457_v47, 0.0 }
  0xbe   : > { %v562_v59 = vadd.f32 %v561_v56, %v530_v53 }
  0xbf   : > { %v481_v31 = vpop.f32.mrf.mxu2 }
  0xc0   : > { %v1201_v33 = vpop.f32.mrf.mxu3  ;;  %v482_v21 = vadd.f32 %v1206_v36, %v481_v31 }
  0xc1   : > { %v458_v32 = vpop.f32.mrf.mxu0 }
  0xc2   : > { %v459_v50 = vadd.f32 %v1206_v36, %v458_v32  ;;  %v920_v32 = vld [vmem:[%s1321_s3 + $0x38] sm:$0xff]  ;;  %v540_v25 = vmax.f32 %v482_v21, 0.0 }
  0xc3   : > { %669 = vmatpush.bf16.msra.mxu1 %v920_v32 }
  0xc4   : > { %v531_v57 = vmax.f32 %v459_v50, 0.0  ;;  %v497_v50 = vadd.f32 %v1206_v36, %v1193_v20  ;;  %v504_v20 = vadd.f32 %v1206_v36, %v1199_v30  ;;  %v915_v30 = vld [vmem:[%s1321_s3 + $0x10] sm:$0xff] }
  0xc6   : > { %v563_v63 = vadd.f32 %v562_v59, %v531_v57  ;;  %v917_v57 = vld [vmem:[%s1321_s3 + $0x20] sm:$0xff]  ;;  %v502_v59 = vadd.f32 %v1206_v36, %v1197_v26 }
  0xc7   : > { %v483_v35 = vpop.f32.mrf.mxu2 }
  0xc8   : > { %v1208_v37 = vpop.f32.mrf.mxu3  ;;  %v484_v29 = vadd.f32 %v1206_v36, %v483_v35  ;;  %v919_v35 = vld [vmem:[%s1321_s3 + $0x30] sm:$0xff] }
  0xc9   : > { %v461_v34 = vpop.f32.mrf.mxu0  ;;  %670 = vmatpush.bf16.msra.mxu1 %v919_v35  ;;  %v509_v26 = vadd.f32 %v1206_v36, %v1208_v37 }
  0xca   : > { %v462_v54 = vadd.f32 %v1206_v36, %v461_v34  ;;  %v541_v28 = vmax.f32 %v484_v29, 0.0 }
  0xcc   : > { %v532_v60 = vmax.f32 %v462_v54, 0.0  ;;  %v499_v54 = vadd.f32 %v1206_v36, %v1195_v23  ;;  %v916_v23 = vld [vmem:[%s1321_s3 + $0x18] sm:$0xff] }
  0xcd   : > { %671 = vmatpush.bf16.msra.mxu1 %v918_v49 }
  0xce   : > { %v564_v1 = vadd.f32 %v563_v63, %v532_v60  ;;  %v548_v63 = vmax.f32 %v502_v59, 0.0 }
  0xcf   : > { %v486_v44 = vpop.f32.mrf.mxu2 }
  0xd0   : > { %v1216_v51 = vpop.f32.mrf.mxu3  ;;  %v487_v34 = vadd.f32 %v1206_v36, %v486_v44 }
  0xd1   : > { %v463_v41 = vpop.f32.mrf.mxu0  ;;  %672 = vmatpush.bf16.msra.mxu1 %v917_v57 }
  0xd2   : > { %v464_v58 = vadd.f32 %v1206_v36, %v463_v41  ;;  %v1062_v41 = vmov 0.0   ;;  %v542_v42 = vmax.f32 %v487_v34, 0.0 }
  0xd3   : > { %255 = vst [vmem:[#allocation2] sm:$0x1] %v1062_v41 }
  0xd4   : > { %v533_v0 = vmax.f32 %v464_v58, 0.0  ;;  %v546_v58 = vmax.f32 %v497_v50, 0.0 }
  0xd5   : > { %673 = vmatpush.bf16.msra.mxu1 %v916_v23 }
  0xd6   : > { %v565_v6 = vadd.f32 %v564_v1, %v533_v0  ;;  %v507_v0 = vadd.f32 %v1206_v36, %v1201_v33  ;;  %v914_v33 = vld [vmem:[%s1321_s3 + $0x8] sm:$0xff] }
  0xd7   : > { %v488_v62 = vpop.f32.mrf.mxu2 }
  0xd8   : > { %v1221_v4 = vpop.f32.mrf.mxu3  ;;  %v489_v39 = vadd.f32 %v1206_v36, %v488_v62 }
  0xd9   : > { %v466_v55 = vpop.f32.mrf.mxu0  ;;  %674 = vmatpush.bf16.msra.mxu1 %v915_v30 }
  0xda   : > { %v467_v61 = vadd.f32 %v1206_v36, %v466_v55  ;;  %v543_v46 = vmax.f32 %v489_v39, 0.0  ;;  %v558_v41 = vld [vmem:[#allocation2] sm:$0x1] }
  0xdc   : > { %v534_v2 = vmax.f32 %v467_v61, 0.0  ;;  %v547_v61 = vmax.f32 %v499_v54, 0.0 }
  0xdd   : > { %675 = vmatpush.bf16.msra.mxu1 %v914_v33 }
  0xde   : > { %v566_v9 = vadd.f32 %v565_v6, %v534_v2  ;;  %v550_v6 = vmax.f32 %v507_v0, 0.0 }
  0xdf   : > { %v491_v14 = vpop.f32.mrf.mxu2 }
  0xe0   : > { %v516_v24 = vpop.f32.mrf.mxu3  ;;  %v492_v43 = vadd.f32 %v1206_v36, %v491_v14 }
  0xe1   : > { %v468_v3 = vpop.f32.mrf.mxu0  ;;  %v517_v12 = vadd.f32 %v1206_v36, %v516_v24 }
  0xe2   : > { %v469_v7 = vadd.f32 %v1206_v36, %v468_v3  ;;  %v544_v52 = vmax.f32 %v492_v43, 0.0  ;;  %v549_v3 = vmax.f32 %v504_v20, 0.0 }
  0xe4   : > { %v535_v10 = vmax.f32 %v469_v7, 0.0  ;;  %v512_v7 = vadd.f32 %v1206_v36, %v1216_v51  ;;  %v913_v51 = vld [vmem:[%s1321_s3] sm:$0xff] }
  0xe5   : > { %676 = vmatpush.bf16.msra.mxu1 %v913_v51 }
  0xe6   : > { %v567_v13 = vadd.f32 %v566_v9, %v535_v10  ;;  %v551_v9 = vmax.f32 %v509_v26, 0.0  ;;  %v514_v10 = vadd.f32 %v1206_v36, %v1221_v4 }
  0xe7   : > { %v493_v31 = vpop.f32.mrf.mxu2 }
  0xe8   : > { %v568_v17 = vadd.f32 %v567_v13, %v536_v11  ;;  %v494_v47 = vadd.f32 %v1206_v36, %v493_v31  ;;  %v518_v48 = vpop.f32.mrf.mxu3  ;;  %v552_v11 = vmax.f32 %v512_v7, 0.0  ;;  %v553_v14 = vmax.f32 %v514_v10, 0.0 }
  0xe9   : > { %v519_v16 = vadd.f32 %v1206_v36, %v518_v48 }
  0xea   : > { %v569_v19 = vadd.f32 %v568_v17, %v537_v15  ;;  %v545_v56 = vmax.f32 %v494_v47, 0.0 }
  0xec   : > { %v570_v22 = vadd.f32 %v569_v19, %v538_v18  ;;  %v554_v18 = vmax.f32 %v517_v12, 0.0 }
  0xee   : > { %v571_v38 = vadd.f32 %v570_v22, %v539_v27  ;;  %v555_v27 = vmax.f32 %v519_v16, 0.0 }
  0xf0   : > { %v572_v40 = vadd.f32 %v571_v38, %v540_v25  ;;  %v521_v2 = vpop.f32.mrf.mxu3 }
  0xf1   : > { %v522_v19 = vadd.f32 %v1206_v36, %v521_v2 }
  0xf2   : > { %v573_v45 = vadd.f32 %v572_v40, %v541_v28 }
  0xf3   : > { %v556_v22 = vmax.f32 %v522_v19, 0.0 }
  0xf4   : > { %v574_v44 = vadd.f32 %v573_v45, %v542_v42 }
  0xf6   : > { %v575_v53 = vadd.f32 %v574_v44, %v543_v46 }
  0xf8   : > { %v576_v55 = vadd.f32 %v575_v53, %v544_v52  ;;  %v523_v17 = vpop.f32.mrf.mxu3 }
  0xf9   : > { %v524_v24 = vadd.f32 %v1206_v36, %v523_v17  ;;  %v620_v36 = vld [vmem:[%s1322_s4] sm:$0x1] }
  0xfa   : > { %v577_v60 = vadd.f32 %v576_v55, %v545_v56 }
  0xfb   : > { %v557_v25 = vmax.f32 %v524_v24, 0.0 }
  0xfc   : > { %v578_v62 = vadd.f32 %v577_v60, %v546_v58 }
  0xfe   : > { %v579_v1 = vadd.f32 %v578_v62, %v547_v61 }
 0x100   : > { %v580_v5 = vadd.f32 %v579_v1, %v548_v63 }
 0x102   : > { %v581_v8 = vadd.f32 %v580_v5, %v549_v3 }
 0x104   : > { %v582_v37 = vadd.f32 %v581_v8, %v550_v6 }
 0x106   : > { %v583_v13 = vadd.f32 %v582_v37, %v551_v9 }
 0x108   : > { %v584_v15 = vadd.f32 %v583_v13, %v552_v11 }
 0x10a   : > { %v585_v21 = vadd.f32 %v584_v15, %v553_v14 }
 0x10c   : > { %v586_v4 = vadd.f32 %v585_v21, %v554_v18 }
 0x10e   : > { %v587_v29 = vadd.f32 %v586_v4, %v555_v27 }
 0x110   : > { %v588_v32 = vadd.f32 %v587_v29, %v556_v22 }
 0x112   : > { %v589_v34 = vadd.f32 %v588_v32, %v557_v25 }
 0x114   : > { %v590_v38 = vrot.slane %v589_v34, 4 }
 0x116   : > { %v591_v28 = vadd.f32 %v590_v38, %v589_v34 }
 0x118   : > { %v592_v39 = vrot.slane %v591_v28, 2 }
 0x11a   : > { %v593_v40 = vadd.f32 %v592_v39, %v591_v28 }
 0x11c   : > { %v594_v31 = vrot.slane %v593_v40, 1 }
 0x11e   : > { %v595_v35 = vadd.f32 %v594_v31, %v593_v40 }
 0x120   : > { %v596_v42 = vadd.f32 %v595_v35, %v558_v41 }
 0x122   : > { %597 = vst [vmem:[#allocation2] sm:$0x1] %v596_v42 }
 0x129   : > { %v601_v43 = vld [vmem:[#allocation2] sm:$0x1] }
 0x12a   : > { %v602_v45 = vmul.f32 0.00390625, %v601_v43 }
 0x12c   : > { %v603_v46 = vpack.c.bf16 %v602_v45, %v602_v45 }
 0x12e   : > { %677 = vmatmul.bf16.vlgmr.msra.gmra.mxu1 %v603_v46 }
 0x1ab   : > { %v678_v44 = vpop.f32.mrf.mxu1 }
 0x1ac   : > { %v679_v47 = vadd.f32 %v678_v44, %v620_v36 }
 0x1ae   : > { %682 = vst [vmem:[%s239_s10] sm:$0x1] %v679_v47 }
 0x1af   : > { %1009 = shalt.err (!%p1006_p5)
}
 0x1b0   : > { %925 = dma.vmem_to_hbm [thread:$0]  (%p1133_p4), %s695_s11, 16, %s697_s12, %s684_s13  }
 0x1b3   : > { %v680_v48 = vpop.f32.mrf.mxu1 }
 0x1b4 PF: > { %p931_p6 = scmp.ge.s32.totalorder %s1060_s23, 2  ;;  %s708_s25 = sand.u32 1, %s1040_s18  }
 0x1b5   : > { %s709_s29 = scalar_lea.sflag [#allocation4], %s708_s25 }
 0x1b6   : > { %p928_p7 = pnand %p931_p6, %p1140_p8 }
 0x1b8   : > { %p929_p9 = pneg %p928_p7 }
 0x1ba   : > { %1035 = dma.done.wait (%p929_p9), %s709_s29, 16  }
 0x1bb   : > { %1037 = vsyncadd (%p929_p9), %s709_s29, 4294967280  ;;  %s18_s23 = sadd.s32 1, %s1060_s23   ;;  %s1326_s18 = smov %s1044_s19 }
 0x1bc   : > { %p15_p10 = scmp.ge.s32.totalorder %s18_s23, 4   ;;  %s1327_s19 = smov %s1048_s20 }
 0x1bd   : > { %s1328_s20 = smov %s1146_s6  ;;  %s1329_s21 = smov %s1056_s22 }
 0x1be   : > { %s1330_s22 = smov %s1332_s26  ;;  %17 = sbr.rel (!%p15_p10) target bundleno = 4 (0x4), region = 83 }
 0x1c3   :  { %714 = vsyncpa [#allocation4], 1 }
 0x1c4   :  { %716 = vsyncpa [#allocation4 + $0x1], 1 }

</bundles_post_ra>
